<compile_context>
chip_gen: v6e
topology: v6e:2x2x1
jax: 0.10.0
libtpu: 0.0.40
codegen_flags: <defaults>
</compile_context>

<pallas_src>
import jax
import jax.numpy as jnp
from jax.experimental import pallas as pl
from jax.experimental.pallas import tpu as pltpu


def _self_attention_kernel(x_ref, w_ref, o_ref):
    # x_ref: (1, C, N); w_ref: (2C, C) = [Wqk ; gamma*Wv]; o_ref: (1, C, N)
    C = w_ref.shape[1]
    x = x_ref[0]                                                      # (C, N) f32

    # Single fused projection: one full 8-sublane MXU tile, then row slices.
    th = jnp.dot(w_ref[...], x, preferred_element_type=jnp.float32)  # (2C, N)
    t = th[:C]                                                        # Wqk @ x
    h = th[C:]                                                        # (gamma*Wv) @ x

    # s[i, j] = sum_c x[c, i] * t[c, j]  ==  x^T (Wq^T Wk) x  ==  f^T g
    s = jax.lax.dot_general(
        x, t, (((0,), (0,)), ((), ())),
        preferred_element_type=jnp.float32)                           # (N, N)

    # softmax over axis 0 (== torch softmax(dim=1) on the (B, N, N) tensor),
    # with normalization deferred past the value matmul.
    s_max = jnp.max(s, axis=0, keepdims=True)                         # (1, N)
    e = jnp.exp(s - s_max)                                            # (N, N)
    denom = jnp.sum(e, axis=0, keepdims=True)                         # (1, N)

    attn_un = jnp.dot(h, e, preferred_element_type=jnp.float32)       # (C, N)
    attn = attn_un * pl.reciprocal(denom, approx=False)               # (C, N)

    o_ref[0] = (attn + x).astype(o_ref.dtype)


def self_attention_forward(x, wq, wk, wv, gamma):
    """x: (B, C, *spatial); wq/wk: (Cd, C); wv: (C, C); gamma: scalar."""
    size = x.shape
    B, C = size[0], size[1]
    N = 1
    for d in size[2:]:
        N *= d
    x3 = x.reshape(B, C, N)

    hi = jax.lax.Precision.HIGHEST
    # Algebraic folds done once in the wrapper (tiny C x C matmuls).
    wqk = jnp.dot(wq.T, wk, precision=hi)                 # (C, C) == Wq^T Wk
    wv_scaled = jnp.asarray(gamma, wv.dtype) * wv         # gamma folded into Wv
    w_stack = jnp.concatenate([wqk, wv_scaled], axis=0)   # (2C, C)

    out = pl.pallas_call(
        _self_attention_kernel,
        out_shape=jax.ShapeDtypeStruct((B, C, N), x.dtype),
        grid=(B,),
        in_specs=[
            pl.BlockSpec((1, C, N), lambda b: (b, 0, 0)),     # per-batch x tile
            pl.BlockSpec((2 * C, C), lambda b: (0, 0)),       # fused weights (resident)
        ],
        out_specs=pl.BlockSpec((1, C, N), lambda b: (b, 0, 0)),
        compiler_params=pltpu.CompilerParams(
            dimension_semantics=("parallel",)),
    )(x3, w_stack)
    return out.reshape(size)


def _reference(x, wq, wk, wv, gamma):
    hi = jax.lax.Precision.HIGHEST
    size = x.shape
    B, C = size[0], size[1]
    xf = x.reshape(B, C, -1)
    f = jnp.einsum("dc,bcn->bdn", wq, xf, precision=hi)
    g = jnp.einsum("dc,bcn->bdn", wk, xf, precision=hi)
    h = jnp.einsum("oc,bcn->bon", wv, xf, precision=hi)
    s = jnp.einsum("bdi,bdj->bij", f, g, precision=hi)
    beta = jax.nn.softmax(s, axis=1)
    o = gamma * jnp.einsum("bci,bij->bcj", h, beta, precision=hi) + xf
    return o.reshape(size)


if __name__ == "__main__":
    # SelfAttention(n_channels=4, div=2) applied to a (2, 4, 16, 16) input -> N = 256.
    batch, n_channels, height, width = 2, 4, 16, 16
    div = 2
    c_qk = n_channels // div if n_channels > 1 else n_channels

    key = jax.random.PRNGKey(0)
    k_x, k_q, k_k, k_v = jax.random.split(key, 4)

    # kaiming_normal_ for a 1x1 conv1d: std = sqrt(2 / fan_in), fan_in = n_channels
    std = (2.0 / n_channels) ** 0.5
    wq = std * jax.random.normal(k_q, (c_qk, n_channels), jnp.float32)
    wk = std * jax.random.normal(k_k, (c_qk, n_channels), jnp.float32)
    wv = std * jax.random.normal(k_v, (n_channels, n_channels), jnp.float32)
    # gamma is initialized to 0 in the module; use a nonzero value here so the
    # attention path (not just the residual) is actually exercised by the check.
    gamma = jnp.float32(0.5)

    x = jax.random.normal(k_x, (batch, n_channels, height, width), jnp.float32)

    out = self_attention_forward(x, wq, wk, wv, gamma)
    out = jax.block_until_ready(out)

    ref = _reference(x, wq, wk, wv, gamma)
    assert out.shape == x.shape
    assert jnp.allclose(out, ref, atol=1e-3, rtol=1e-3), (
        float(jnp.max(jnp.abs(out - ref))))

    print("KERNEL_OK")
</pallas_src>

<mosaic_0001>
module attributes {stable_mosaic.version = 11 : i64} {
  func.func @_self_attention_kernel(%arg0: i32, %arg1: memref<1x4x256xf32, #tpu.memory_space<vmem>>, %arg2: memref<8x4xf32, #tpu.memory_space<vmem>>, %arg3: memref<1x4x256xf32, #tpu.memory_space<vmem>>) attributes {dimension_semantics = [#tpu.dimension_semantics<parallel>], iteration_bounds = array<i64: 2>, scalar_prefetch = 0 : i64, scratch_operands = 0 : i64, tpu.core_type = #tpu.core_type<tc>, window_params = [{transform_indices = @transform_0, window_bounds = array<i64: 1, 4, 256>}, {pipeline_mode = #tpu.pipeline_mode<synchronous>, transform_indices = @transform_1, window_bounds = array<i64: 8, 4>}, {transform_indices = @transform_2, window_bounds = array<i64: 1, 4, 256>}]} {
    %c0 = arith.constant 0 : index
    %c0_0 = arith.constant 0 : index
    %c0_1 = arith.constant 0 : index
    %0 = vector.load %arg1[%c0, %c0_0, %c0_1] : memref<1x4x256xf32, #tpu.memory_space<vmem>>, vector<1x4x256xf32>
    %1 = vector.shape_cast %0 : vector<1x4x256xf32> to vector<4x256xf32>
    %c0_2 = arith.constant 0 : index
    %c0_3 = arith.constant 0 : index
    %2 = vector.load %arg2[%c0_2, %c0_3] : memref<8x4xf32, #tpu.memory_space<vmem>>, vector<8x4xf32>
    %cst = arith.constant dense<0.000000e+00> : vector<8x256xf32>
    %3 = tpu.matmul %2, %1, %cst {dimension_numbers = #tpu.dot_dimension_numbers<[1], [0], [0], [1], [0, 0, 1, 1], [], []>} : vector<8x4xf32>, vector<4x256xf32>, vector<8x256xf32> -> vector<8x256xf32>
    %4 = vector.extract_strided_slice %3 {offsets = [0, 0], sizes = [4, 256], strides = [1, 1]} : vector<8x256xf32> to vector<4x256xf32>
    %5 = vector.extract_strided_slice %3 {offsets = [4, 0], sizes = [4, 256], strides = [1, 1]} : vector<8x256xf32> to vector<4x256xf32>
    %cst_4 = arith.constant dense<0.000000e+00> : vector<256x256xf32>
    %6 = tpu.matmul %1, %4, %cst_4 {dimension_numbers = #tpu.dot_dimension_numbers<[0], [0], [1], [1], [0, 1, 1, 1], [], []>} : vector<4x256xf32>, vector<4x256xf32>, vector<256x256xf32> -> vector<256x256xf32>
    %cst_5 = arith.constant dense<0xFF800000> : vector<256xf32>
    %7 = vector.multi_reduction <maximumf>, %6, %cst_5 [0] : vector<256x256xf32> to vector<256xf32>
    %8 = vector.shape_cast %7 : vector<256xf32> to vector<1x256xf32>
    %9 = vector.broadcast %8 : vector<1x256xf32> to vector<256x256xf32>
    %10 = arith.subf %6, %9 : vector<256x256xf32>
    %11 = math.exp %10 : vector<256x256xf32>
    %cst_6 = arith.constant dense<0.000000e+00> : vector<256xf32>
    %12 = vector.multi_reduction <add>, %11, %cst_6 [0] : vector<256x256xf32> to vector<256xf32>
    %13 = vector.shape_cast %12 : vector<256xf32> to vector<1x256xf32>
    %cst_7 = arith.constant dense<0.000000e+00> : vector<4x256xf32>
    %14 = tpu.matmul %5, %11, %cst_7 {dimension_numbers = #tpu.dot_dimension_numbers<[1], [0], [0], [1], [0, 0, 1, 1], [], []>} : vector<4x256xf32>, vector<256x256xf32>, vector<4x256xf32> -> vector<4x256xf32>
    %15 = tpu.reciprocal %13 : vector<1x256xf32> -> vector<1x256xf32>
    %16 = vector.broadcast %15 : vector<1x256xf32> to vector<4x256xf32>
    %17 = arith.mulf %14, %16 : vector<4x256xf32>
    %18 = arith.addf %17, %1 : vector<4x256xf32>
    %c0_8 = arith.constant 0 : index
    %c0_9 = arith.constant 0 : index
    %c0_10 = arith.constant 0 : index
    %19 = vector.load %arg3[%c0_8, %c0_9, %c0_10] : memref<1x4x256xf32, #tpu.memory_space<vmem>>, vector<1x4x256xf32>
    %20 = vector.shape_cast %19 : vector<1x4x256xf32> to vector<4x256xf32>
    %21 = vector.shape_cast %18 : vector<4x256xf32> to vector<1x4x256xf32>
    tpu.vector_store %arg3[%c0_8, %c0_9, %c0_10], %21 {strides = array<i32>} : memref<1x4x256xf32, #tpu.memory_space<vmem>>, vector<1x4x256xf32>,
    return
  }
  func.func @transform_0(%arg0: i32) -> (i32, i32, i32) {
    %c0_i32 = arith.constant 0 : i32
    %c0_i32_0 = arith.constant 0 : i32
    %c0_i32_1 = arith.constant 0 : i32
    return %arg0, %c0_i32, %c0_i32_0 : i32, i32, i32
  }
  func.func @transform_1(%arg0: i32) -> (i32, i32) {
    %c0_i32 = arith.constant 0 : i32
    %c0_i32_0 = arith.constant 0 : i32
    %c0_i32_1 = arith.constant 0 : i32
    return %c0_i32, %c0_i32_0 : i32, i32
  }
  func.func @transform_2(%arg0: i32) -> (i32, i32, i32) {
    %c0_i32 = arith.constant 0 : i32
    %c0_i32_0 = arith.constant 0 : i32
    %c0_i32_1 = arith.constant 0 : i32
    return %arg0, %c0_i32, %c0_i32_0 : i32, i32, i32
  }
}

</mosaic_0001>

<bundles_post_ra>
// kernel: tpu_custom_call.1
= control target key start
LH: loop header
LB: loop body
LE: loop exit
PB: predicated region body
PF: predicated region fallthrough
CT: control target
= control target key end

     0   :  { %7 = vsyncpa [#allocation3], 0  ;;  %s2268_s0 = inlined_call_operand.hbm [shape: f32[2,4,256], index: 0, kind: input, shape index: {}]   ;;  %s2269_s1 = inlined_call_operand.vmem [shape: f32[8,4], index: 1, kind: input, shape index: {}]   ;;  %s2270_s2 = inlined_call_operand.hbm [shape: f32[2,4,256], index: 2, kind: output, shape index: {}]  }
   0x1   :  { %9 = vsyncpa [#allocation3 + $0x1], 0 }
   0x2   :  { %10 = vsyncpa [#allocation4], 0 }
   0x3   :  { %12 = vsyncpa [#allocation4 + $0x1], 0  ;;  %s1525_s9 = smov 0   ;;  %s1527_s10 = smov 0  }
   0x4   :  { %s1529_s11 = smov 0   ;;  %s1531_s12 = smov 0  }
   0x5 LB: > { %s1546_s13 = sadd.s32 4294967295, %s1505_s12   ;;  %s1179_s14 = sadd.s32 4294967294, %s1505_s12   ;;  %s1505_s12 = sphi %s1531_s12, %s2353_s12   ;;  %s1501_s11 = sphi %s1529_s11, %s2352_s11   ;;  %s1497_s10 = sphi %s1527_s10, %s2351_s10   ;;  %s1493_s9 = sphi %s1525_s9, %s2350_s9  }
   0x6   : > { %s1550_s15 = sadd.s32 1, %s1505_s12   ;;  %s25_s16 = sadd.s32 1, %s1501_s11 }
   0x7   : > { %s22_s17 = ssub.s32 %s1505_s12, %s1550_s15  ;;  %p32_p0 = scmp.ne.s32.totalorder %s1501_s11, %s1497_s10 }
   0x8   : > { %p23_p1 = scmp.eq.s32.totalorder %s22_s17, 0  ;;  %p33_p2 = scmp.eq.s32.totalorder %s1505_s12, 0 }
   0x9   : > { %p38_p3 = scmp.ne.s32.totalorder %s1497_s10, %s1493_s9  ;;  %p39_p4 = scmp.eq.s32.totalorder %s1546_s13, 0 }
   0xa   : > { %s1562_s18 = scalar_select %p23_p1, %s1501_s11, %s25_s16  }
   0xb   : > { %p1564_p5 = por %p33_p2, %p32_p0  ;;  %p1568_p6 = por %p39_p4, %p38_p3 }
   0xc   : > { %p83_p7 = scmp.eq.s32.totalorder %s1546_s13, 1  ;;  %p89_p8 = scmp.eq.s32.totalorder %s1179_s14, 1 }
   0xd   : > { %s2296_s20 = scalar_select %p1568_p6, 1, 0 }
   0xe   : > { %p1244_p10 = scmp.lt.s32.totalorder %s1505_s12, 2  ;;  %p1575_p11 = por %p83_p7, %p32_p0 }
   0xf   : > { %p1579_p12 = por %p89_p8, %p38_p3  ;;  %s112_s23 = sand.u32 1, %s1501_s11  }
  0x10   : > { %s2297_s21 = scalar_select %p1575_p11, 1, 0 }
  0x11   : > { %s2298_s22 = scalar_select %p1579_p12, 1, 0 }
  0x12   : > { %s1230_s24 = sshll.u32 %s1505_s12, 7  ;;  %s1182_s25 = sshll.u32 %s112_s23, 3 }
  0x13   : > { %s1588_s28 = scalar_lea.hbm %s2268_s0, %s1230_s24  ;;  %s116_s29 = scalar_lea.vmem [#allocation2], %s1182_s25 }
  0x14   : > { %s124_s30 = sshll.u32 %s116_s29, 4  ;;  %p1592_p13 = pnand %p1244_p10, %p1564_p5  ;;  %s1596_s30 = int_to_ptr.vmem [resolvable:$true] %s124_s30 }
  0x15   : > { %s113_s4 = scalar_lea.sflag [#allocation3], %s112_s23  ;;  %s1413_s5 = scalar_lea.hbm %s1588_s28, 128 }
  0x16   : > { %p1414_p2 = scmp.ne.s32.totalorder %s1588_s28, %s1413_s5  ;;  %p1415_p3 = pneg %p1592_p13 }
  0x17   : > { %s1418_s8 = scalar_lea.hbm %s2268_s0, 256  ;;  %p1419_p5 = scmp.lt.s32.totalorder %s1588_s28, %s2268_s0 }
  0x18   : > { %p1416_p4 = pnand %p1415_p3, %p1414_p2  ;;  %p1420_p8 = scmp.lt.s32.totalorder %s1418_s8, %s1413_s5 }
  0x1a   : > { %p1417_p7 = pneg %p1416_p4  ;;  %p1421_p10 = por %p1420_p8, %p1419_p5 }
  0x1c   : > { %p1422_p9 = pnand %p1421_p10, %p1417_p7 }
  0x1e   : > { %1425 = shalt.err (!%p1422_p9)
}
  0x1f   : > { %s1426_s17 = scalar_lea.vmem %s1596_s30, 128  ;;  %s1507_s19 = smov [#allocation2]  }
  0x20   : > { %p1427_p0 = scmp.ne.s32.totalorder %s1596_s30, %s1426_s17  ;;  %s1431_s23 = sshll.u32 %s1507_s19, 4  ;;  %s1432_s23 = int_to_ptr.vmem [resolvable:$false] %s1431_s23 }
  0x21   : > { %s1433_s24 = scalar_lea.vmem %s1432_s23, 256  ;;  %p1434_p4 = scmp.lt.s32.totalorder %s1596_s30, %s1432_s23 }
  0x22   : > { %p1429_p1 = pnand %p1427_p0, %p1415_p3  ;;  %p1435_p12 = scmp.lt.s32.totalorder %s1433_s24, %s1426_s17 }
  0x24   : > { %p1430_p2 = pneg %p1429_p1  ;;  %p1436_p11 = por %p1435_p12, %p1434_p4 }
  0x26   : > { %p1437_p6 = pnand %p1436_p11, %p1430_p2 }
  0x28   : > { %1440 = shalt.err (!%p1437_p6)
}
  0x29   : > { %1239 = dma.hbm_to_vmem [thread:$0]  (!%p1592_p13), %s1588_s28, 128, %s1596_s30, %s113_s4  }
  0x2a   : > { %p2300_p9 = scmp.lt.s32.totalorder %s1505_s12, 3  ;;  %p2301_p7 = scmp.ge.s32.totalorder %s1505_s12, 1 }
  0x2c   : > { %p130_p0 = pnand %p2301_p7, %p2300_p9 }
  0x2e   : > { %133 = sbr.rel (%p130_p0) target bundleno = 930 (0x3a2), region = 28 }
  0x33   : > { %s1623_s25 = sand.u32 1, %s1497_s10   ;;  %p2302_p6 = scmp.ne.s32.totalorder %s2296_s20, 0 }
  0x34   : > { %s1186_s26 = sshll.u32 %s1623_s25, 3  ;;  %s136_s27 = scalar_lea.sflag [#allocation3], %s1623_s25 }
  0x35   : > { %s1629_s29 = scalar_lea.vmem [#allocation2], %s1186_s26 }
  0x36   : > { %1484 = dma.done.wait (%p2302_p6), %s136_s27, 128  }
  0x37   : > { %1486 = vsyncadd (%p2302_p6), %s136_s27, 4294967168  ;;  %v1508_v0 = vmov 0.0   ;;  %v160_v1 = vld [vmem:[%s1629_s29] sm:$0xff]  ;;  %vm168_vm0 = vcmask 1043456   ;;  %vm164_vm1 = vcmask 31744   ;;  %s1231_s20 = sshll.u32 %s1546_s13, 7 }
  0x38   : > { %237 = vmatprep.mubr.f32.mxu0 %v1508_v0  ;;  %475 = vmatprep.mubr.f32.mxu1 %v1508_v0  ;;  %v1638_v2 = vcombine.high %v160_v1, %v160_v1  ;;  %v161_v3 = vld [vmem:[%s2269_s1] sm:$0xff]  ;;  %s159_s3 = scalar_lea.vmem [#allocation5], %s1186_s26  ;;  %s1107_s7 = scalar_lea.hbm %s2270_s2, %s1231_s20 }
  0x39   : > { %245 = vxpose.xlu0.b32.start.end [1/1] (short) %v160_v1, 128  ;;  %s1109_s4 = sshll.u32 %s159_s3, 4  ;;  %s1095_s8 = scalar_lea.sflag [#allocation4], %s1623_s25  ;;  %s1110_s4 = int_to_ptr.vmem [resolvable:$true] %s1109_s4 }
  0x3a   : > { %2303 = vst [vmem:[#allocation8_spill] sm:$0xff] %v1638_v2  ;;  %1188 = vmatprep.subr.msk.mxu0 %vm168_vm0, %v1638_v2  ;;  %s1441_s14 = scalar_lea.vmem %s1110_s4, 128  ;;  %p2347_p12 = scmp.ne.s32.totalorder %s2297_s21, 0 }
  0x3b   : > { %1189 = vmatpush1.msk.msra.mxu0 %vm168_vm0, %v160_v1  ;;  %p1442_p11 = scmp.ne.s32.totalorder %s1110_s4, %s1441_s14  ;;  %s1509_s13 = smov [#allocation5]  }
  0x3c   : > { %1190 = vmatmul.mubr.msk.f32.vlgmr.msra.gmra.mxu0 %vm164_vm1, %v161_v3  ;;  %s1445_s16 = sshll.u32 %s1509_s13, 4  ;;  %s1446_s16 = int_to_ptr.vmem [resolvable:$false] %s1445_s16 }
  0x3d   : > { %p1443_p13 = pnand %p1442_p11, %p2347_p12  ;;  %s1447_s17 = scalar_lea.vmem %s1446_s16, 256 }
  0x3e   : > { %p1448_p3 = scmp.lt.s32.totalorder %s1110_s4, %s1446_s16  ;;  %p1449_p5 = scmp.lt.s32.totalorder %s1447_s17, %s1441_s14 }
  0x3f   : > { %p1444_p1 = pneg %p1443_p13 }
  0x40   : > { %p1450_p8 = por %p1449_p5, %p1448_p3 }
  0x42   : > { %p1451_p10 = pnand %p1450_p8, %p1444_p1 }
  0x76   : > { %277 = vxpose.xlu0.b32.start.end [1/1] (short) %v1638_v2, 128 }
  0xb5   : > { %v261_v4 = vpop.trf.xlu0 }
  0xb9   : > { %v262_v5 = vpop.trf.xlu0 }
  0xbd   : > { %v263_v6 = vpop.trf.xlu0 }
  0xc1   : > { %v264_v7 = vpop.trf.xlu0 }
  0xc5   : > { %v265_v8 = vpop.trf.xlu0 }
  0xc9   : > { %v266_v9 = vpop.trf.xlu0 }
  0xcd   : > { %v267_v10 = vpop.trf.xlu0 }
  0xd1   : > { %v268_v11 = vpop.trf.xlu0 }
  0xd5   : > { %v269_v12 = vpop.trf.xlu0 }
  0xd9   : > { %v270_v13 = vpop.trf.xlu0 }
  0xdd   : > { %v271_v15 = vpop.trf.xlu0 }
  0xe1   : > { %v272_v18 = vpop.trf.xlu0 }
  0xe5   : > { %v273_v19 = vpop.trf.xlu0 }
  0xe9   : > { %v274_v20 = vpop.trf.xlu0 }
  0xed   : > { %v275_v21 = vpop.trf.xlu0 }
  0xf1   : > { %v276_v22 = vpop.trf.xlu0 }
  0xf5   : > { %v293_v23 = vpop.trf.xlu0 }
  0xf9   : > { %v294_v24 = vpop.trf.xlu0 }
  0xfc   : > { %v1648_v14 = vpop.f32.mrf.mxu0 }
  0xfd   : > { %2304 = vst [vmem:[#allocation9_spill] sm:$0xff] %v1648_v14  ;;  %v295_v25 = vpop.trf.xlu0 }
  0xfe   : > { %v241_v16 = vpop.f32.mrf.mxu0 }
  0xff   : > { %v1009_v17 = vrot.slane %v241_v16, 4  ;;  %1191 = vmatprep.subr.msk.mxu1 %vm168_vm0, %v241_v16 }
 0x100   : > { %1192 = vmatpush1.msk.msra.mxu1 %vm168_vm0, %v1648_v14 }
 0x101   : > { %1193 = vmatmul.mubr.msk.f32.vlgmr.msra.gmra.mxu1 %vm164_vm1, %v261_v4  ;;  %1076 = vmatprep.mubr.f32.mxu0 %v1009_v17  ;;  %v296_v26 = vpop.trf.xlu0 }
 0x102   : > { %481 = vmatprep.mubr.f32.mxu1 %v1508_v0 }
 0x105   : > { %1194 = vmatmul.mubr.msk.f32.gmra.mxu1 %vm164_vm1, %v262_v5  ;;  %v297_v27 = vpop.trf.xlu0 }
 0x106   : > { %487 = vmatprep.mubr.f32.mxu1 %v1508_v0 }
 0x109   : > { %1195 = vmatmul.mubr.msk.f32.gmra.mxu1 %vm164_vm1, %v263_v6  ;;  %v298_v28 = vpop.trf.xlu0 }
 0x10a   : > { %493 = vmatprep.mubr.f32.mxu1 %v1508_v0 }
 0x10d   : > { %1196 = vmatmul.mubr.msk.f32.gmra.mxu1 %vm164_vm1, %v264_v7  ;;  %v299_v29 = vpop.trf.xlu0 }
 0x10e   : > { %499 = vmatprep.mubr.f32.mxu1 %v1508_v0 }
 0x111   : > { %1197 = vmatmul.mubr.msk.f32.gmra.mxu1 %vm164_vm1, %v265_v8  ;;  %v300_v30 = vpop.trf.xlu0 }
 0x112   : > { %505 = vmatprep.mubr.f32.mxu1 %v1508_v0 }
 0x115   : > { %1198 = vmatmul.mubr.msk.f32.gmra.mxu1 %vm164_vm1, %v266_v9  ;;  %v301_v31 = vpop.trf.xlu0 }
 0x116   : > { %511 = vmatprep.mubr.f32.mxu1 %v1508_v0 }
 0x119   : > { %1199 = vmatmul.mubr.msk.f32.gmra.mxu1 %vm164_vm1, %v267_v10  ;;  %v302_v32 = vpop.trf.xlu0 }
 0x11a   : > { %517 = vmatprep.mubr.f32.mxu1 %v1508_v0 }
 0x11d   : > { %1200 = vmatmul.mubr.msk.f32.gmra.mxu1 %vm164_vm1, %v268_v11  ;;  %v303_v33 = vpop.trf.xlu0 }
 0x11e   : > { %523 = vmatprep.mubr.f32.mxu1 %v1508_v0 }
 0x121   : > { %1201 = vmatmul.mubr.msk.f32.gmra.mxu1 %vm164_vm1, %v269_v12  ;;  %v304_v34 = vpop.trf.xlu0 }
 0x122   : > { %529 = vmatprep.mubr.f32.mxu1 %v1508_v0 }
 0x125   : > { %1202 = vmatmul.mubr.msk.f32.gmra.mxu1 %vm164_vm1, %v270_v13  ;;  %v305_v35 = vpop.trf.xlu0 }
 0x126   : > { %535 = vmatprep.mubr.f32.mxu1 %v1508_v0 }
 0x129   : > { %1203 = vmatmul.mubr.msk.f32.gmra.mxu1 %vm164_vm1, %v271_v15  ;;  %v306_v36 = vpop.trf.xlu0 }
 0x12a   : > { %541 = vmatprep.mubr.f32.mxu1 %v1508_v0 }
 0x12d   : > { %1204 = vmatmul.mubr.msk.f32.gmra.mxu1 %vm164_vm1, %v272_v18  ;;  %v307_v37 = vpop.trf.xlu0 }
 0x12e   : > { %547 = vmatprep.mubr.f32.mxu1 %v1508_v0 }
 0x131   : > { %1205 = vmatmul.mubr.msk.f32.gmra.mxu1 %vm164_vm1, %v273_v19  ;;  %v308_v38 = vpop.trf.xlu0 }
 0x132   : > { %553 = vmatprep.mubr.f32.mxu1 %v1508_v0 }
 0x135   : > { %1206 = vmatmul.mubr.msk.f32.gmra.mxu1 %vm164_vm1, %v274_v20 }
 0x136   : > { %559 = vmatprep.mubr.f32.mxu1 %v1508_v0 }
 0x139   : > { %1207 = vmatmul.mubr.msk.f32.gmra.mxu1 %vm164_vm1, %v275_v21 }
 0x13a   : > { %565 = vmatprep.mubr.f32.mxu1 %v1508_v0 }
 0x13d   : > { %1208 = vmatmul.mubr.msk.f32.gmra.mxu1 %vm164_vm1, %v276_v22 }
 0x13e   : > { %571 = vmatprep.mubr.f32.mxu1 %v1508_v0 }
 0x141   : > { %1209 = vmatmul.mubr.msk.f32.gmra.mxu1 %vm164_vm1, %v293_v23 }
 0x142   : > { %577 = vmatprep.mubr.f32.mxu1 %v1508_v0 }
 0x145   : > { %1210 = vmatmul.mubr.msk.f32.gmra.mxu1 %vm164_vm1, %v294_v24 }
 0x146   : > { %583 = vmatprep.mubr.f32.mxu1 %v1508_v0 }
 0x149   : > { %1211 = vmatmul.mubr.msk.f32.gmra.mxu1 %vm164_vm1, %v295_v25 }
 0x14a   : > { %589 = vmatprep.mubr.f32.mxu1 %v1508_v0 }
 0x14d   : > { %1212 = vmatmul.mubr.msk.f32.gmra.mxu1 %vm164_vm1, %v296_v26 }
 0x14e   : > { %595 = vmatprep.mubr.f32.mxu1 %v1508_v0 }
 0x151   : > { %1213 = vmatmul.mubr.msk.f32.gmra.mxu1 %vm164_vm1, %v297_v27 }
 0x152   : > { %601 = vmatprep.mubr.f32.mxu1 %v1508_v0 }
 0x155   : > { %1214 = vmatmul.mubr.msk.f32.gmra.mxu1 %vm164_vm1, %v298_v28 }
 0x156   : > { %607 = vmatprep.mubr.f32.mxu1 %v1508_v0 }
 0x159   : > { %1215 = vmatmul.mubr.msk.f32.gmra.mxu1 %vm164_vm1, %v299_v29 }
 0x15a   : > { %613 = vmatprep.mubr.f32.mxu1 %v1508_v0 }
 0x15d   : > { %1216 = vmatmul.mubr.msk.f32.gmra.mxu1 %vm164_vm1, %v300_v30 }
 0x15e   : > { %619 = vmatprep.mubr.f32.mxu1 %v1508_v0 }
 0x161   : > { %1217 = vmatmul.mubr.msk.f32.gmra.mxu1 %vm164_vm1, %v301_v31 }
 0x162   : > { %625 = vmatprep.mubr.f32.mxu1 %v1508_v0 }
 0x165   : > { %1218 = vmatmul.mubr.msk.f32.gmra.mxu1 %vm164_vm1, %v302_v32 }
 0x166   : > { %631 = vmatprep.mubr.f32.mxu1 %v1508_v0 }
 0x169   : > { %1219 = vmatmul.mubr.msk.f32.gmra.mxu1 %vm164_vm1, %v303_v33 }
 0x16a   : > { %637 = vmatprep.mubr.f32.mxu1 %v1508_v0 }
 0x16d   : > { %1220 = vmatmul.mubr.msk.f32.gmra.mxu1 %vm164_vm1, %v304_v34 }
 0x16e   : > { %643 = vmatprep.mubr.f32.mxu1 %v1508_v0 }
 0x171   : > { %1221 = vmatmul.mubr.msk.f32.gmra.mxu1 %vm164_vm1, %v305_v35 }
 0x172   : > { %649 = vmatprep.mubr.f32.mxu1 %v1508_v0 }
 0x175   : > { %1222 = vmatmul.mubr.msk.f32.gmra.mxu1 %vm164_vm1, %v306_v36 }
 0x176   : > { %655 = vmatprep.mubr.f32.mxu1 %v1508_v0 }
 0x179   : > { %1223 = vmatmul.mubr.msk.f32.gmra.mxu1 %vm164_vm1, %v307_v37 }
 0x17a   : > { %661 = vmatprep.mubr.f32.mxu1 %v1508_v0 }
 0x17d   : > { %1224 = vmatmul.mubr.msk.f32.gmra.mxu1 %vm164_vm1, %v308_v38 }
 0x1c1   : > { %v1716_v39 = vpop.f32.mrf.mxu1 }
 0x1c3   : > { %v1718_v40 = vpop.f32.mrf.mxu1 }
 0x1c5   : > { %v1720_v41 = vpop.f32.mrf.mxu1 }
 0x1c7   : > { %v1722_v42 = vpop.f32.mrf.mxu1 }
 0x1c8   : > { %2305 = vst [vmem:[#allocation10_spill] sm:$0xff] %v1722_v42 }
 0x1c9   : > { %v1724_v43 = vpop.f32.mrf.mxu1 }
 0x1ca   : > { %v668_v26 = vmax.f32 %v1716_v39, %v1724_v43 }
 0x1cb   : > { %v1726_v44 = vpop.f32.mrf.mxu1 }
 0x1cc   : > { %2306 = vst [vmem:[#allocation11_spill] sm:$0xff] %v1726_v44 }
 0x1cd   : > { %v1728_v45 = vpop.f32.mrf.mxu1 }
 0x1ce   : > { %v669_v27 = vmax.f32 %v1720_v41, %v1728_v45 }
 0x1cf   : > { %v1730_v46 = vpop.f32.mrf.mxu1 }
 0x1d0   : > { %2307 = vst [vmem:[#allocation12_spill] sm:$0xff] %v1730_v46 }
 0x1d1   : > { %v1732_v47 = vpop.f32.mrf.mxu1 }
 0x1d2   : > { %v670_v29 = vmax.f32 %v668_v26, %v1732_v47 }
 0x1d3   : > { %v1734_v48 = vpop.f32.mrf.mxu1 }
 0x1d5   : > { %v1736_v49 = vpop.f32.mrf.mxu1 }
 0x1d6   : > { %v671_v30 = vmax.f32 %v669_v27, %v1736_v49 }
 0x1d7   : > { %v1738_v50 = vpop.f32.mrf.mxu1 }
 0x1d8   : > { %2308 = vst [vmem:[#allocation13_spill] sm:$0xff] %v1738_v50 }
 0x1d9   : > { %v1740_v51 = vpop.f32.mrf.mxu1 }
 0x1da   : > { %v672_v32 = vmax.f32 %v670_v29, %v1740_v51 }
 0x1db   : > { %v1742_v52 = vpop.f32.mrf.mxu1 }
 0x1dd   : > { %v1744_v53 = vpop.f32.mrf.mxu1 }
 0x1de   : > { %v673_v33 = vmax.f32 %v671_v30, %v1744_v53 }
 0x1df   : > { %v1746_v54 = vpop.f32.mrf.mxu1 }
 0x1e0   : > { %2309 = vst [vmem:[#allocation14_spill] sm:$0xff] %v1746_v54 }
 0x1e1   : > { %v1748_v55 = vpop.f32.mrf.mxu1 }
 0x1e2   : > { %2310 = vst [vmem:[#allocation15_spill] sm:$0xff] %v1748_v55  ;;  %v674_v35 = vmax.f32 %v672_v32, %v1748_v55 }
 0x1e3   : > { %v1750_v56 = vpop.f32.mrf.mxu1 }
 0x1e4   : > { %2311 = vst [vmem:[#allocation16_spill] sm:$0xff] %v1750_v56 }
 0x1e5   : > { %v1752_v57 = vpop.f32.mrf.mxu1 }
 0x1e6   : > { %v675_v36 = vmax.f32 %v673_v33, %v1752_v57 }
 0x1e7   : > { %v1754_v58 = vpop.f32.mrf.mxu1 }
 0x1e8   : > { %2312 = vst [vmem:[#allocation17_spill] sm:$0xff] %v1754_v58 }
 0x1e9   : > { %v1756_v59 = vpop.f32.mrf.mxu1 }
 0x1ea   : > { %2313 = vst [vmem:[#allocation18_spill] sm:$0xff] %v1756_v59  ;;  %v676_v38 = vmax.f32 %v674_v35, %v1756_v59 }
 0x1eb   : > { %v1758_v60 = vpop.f32.mrf.mxu1 }
 0x1ed   : > { %v1760_v61 = vpop.f32.mrf.mxu1 }
 0x1ee   : > { %v677_v26 = vmax.f32 %v675_v36, %v1760_v61 }
 0x1ef   : > { %v1762_v62 = vpop.f32.mrf.mxu1 }
 0x1f1   : > { %v1764_v63 = vpop.f32.mrf.mxu1 }
 0x1f2   : > { %2314 = vst [vmem:[#allocation19_spill] sm:$0xff] %v1764_v63  ;;  %v678_v27 = vmax.f32 %v676_v38, %v1764_v63 }
 0x1f3   : > { %v1766_v0 = vpop.f32.mrf.mxu1 }
 0x1f5   : > { %v1768_v1 = vpop.f32.mrf.mxu1 }
 0x1f6   : > { %v679_v29 = vmax.f32 %v677_v26, %v1768_v1  ;;  %v706_v26 = vmax.f32 %v1722_v42, %v1730_v46 }
 0x1f7   : > { %v1770_v3 = vpop.f32.mrf.mxu1 }
 0x1f9   : > { %v1772_v4 = vpop.f32.mrf.mxu1 }
 0x1fa   : > { %v680_v30 = vmax.f32 %v678_v27, %v1772_v4 }
 0x1fb   : > { %v1774_v5 = vpop.f32.mrf.mxu1 }
 0x1fd   : > { %v1776_v6 = vpop.f32.mrf.mxu1 }
 0x1fe   : > { %2315 = vst [vmem:[#allocation20_spill] sm:$0xff] %v1776_v6  ;;  %v681_v32 = vmax.f32 %v679_v29, %v1776_v6 }
 0x1ff   : > { %v1778_v7 = vpop.f32.mrf.mxu1 }
 0x201   : > { %v1780_v8 = vpop.f32.mrf.mxu1 }
 0x202   : > { %v682_v33 = vmax.f32 %v680_v30, %v1780_v8  ;;  %v705_v30 = vmax.f32 %v1718_v40, %v1726_v44 }
 0x203   : > { %v1782_v9 = vpop.f32.mrf.mxu1 }
 0x205   : > { %v1784_v10 = vpop.f32.mrf.mxu1 }
 0x206   : > { %v683_v35 = vmax.f32 %v681_v32, %v1784_v10  ;;  %v708_v32 = vmax.f32 %v706_v26, %v1738_v50 }
 0x207   : > { %v1786_v11 = vpop.f32.mrf.mxu1 }
 0x208   : > { %v710_v46 = vmax.f32 %v708_v32, %v1746_v54 }
 0x209   : > { %v1788_v12 = vpop.f32.mrf.mxu1 }
 0x20a   : > { %2316 = vst [vmem:[#allocation21_spill] sm:$0xff] %v1788_v12  ;;  %v684_v36 = vmax.f32 %v682_v33, %v1788_v12  ;;  %v707_v12 = vmax.f32 %v705_v30, %v1734_v48  ;;  %v712_v26 = vmax.f32 %v710_v46, %v1754_v58 }
 0x20b   : > { %v1790_v13 = vpop.f32.mrf.mxu1 }
 0x20c   : > { %v709_v44 = vmax.f32 %v707_v12, %v1742_v52  ;;  %v714_v32 = vmax.f32 %v712_v26, %v1762_v62 }
 0x20d   : > { %v1792_v15 = vpop.f32.mrf.mxu1 }
 0x20e   : > { %2317 = vst [vmem:[#allocation22_spill] sm:$0xff] %v1792_v15  ;;  %v685_v38 = vmax.f32 %v683_v35, %v1792_v15  ;;  %v711_v30 = vmax.f32 %v709_v44, %v1750_v56  ;;  %v716_v46 = vmax.f32 %v714_v32, %v1770_v3 }
 0x20f   : > { %v1794_v16 = vpop.f32.mrf.mxu1 }
 0x210   : > { %v713_v12 = vmax.f32 %v711_v30, %v1758_v60  ;;  %v718_v44 = vmax.f32 %v716_v46, %v1778_v7 }
 0x211   : > { %v1796_v17 = vpop.f32.mrf.mxu1 }
 0x212   : > { %v686_v27 = vmax.f32 %v684_v36, %v1796_v17  ;;  %v715_v58 = vmax.f32 %v713_v12, %v1766_v0 }
 0x213   : > { %v1798_v18 = vpop.f32.mrf.mxu1 }
 0x214   : > { %v717_v26 = vmax.f32 %v715_v58, %v1774_v5 }
 0x215   : > { %v1800_v19 = vpop.f32.mrf.mxu1 }
 0x216   : > { %v687_v29 = vmax.f32 %v685_v38, %v1800_v19 }
 0x217   : > { %v1802_v20 = vpop.f32.mrf.mxu1 }
 0x219   : > { %v1804_v21 = vpop.f32.mrf.mxu1 }
 0x21a   : > { %v688_v33 = vmax.f32 %v686_v27, %v1804_v21 }
 0x21b   : > { %v1806_v22 = vpop.f32.mrf.mxu1 }
 0x21d   : > { %v1808_v23 = vpop.f32.mrf.mxu1 }
 0x21e   : > { %v689_v35 = vmax.f32 %v687_v29, %v1808_v23 }
 0x21f   : > { %v1810_v24 = vpop.f32.mrf.mxu1 }
 0x221   : > { %v1812_v25 = vpop.f32.mrf.mxu1 }
 0x222   : > { %v690_v36 = vmax.f32 %v688_v33, %v1812_v25 }
 0x223   : > { %v1818_v28 = vpop.f32.mrf.mxu1 }
 0x225   : > { %v1822_v31 = vpop.f32.mrf.mxu1 }
 0x226   : > { %v691_v38 = vmax.f32 %v689_v35, %v1822_v31 }
 0x227   : > { %v1826_v34 = vpop.f32.mrf.mxu1 }
 0x229   : > { %v1830_v37 = vpop.f32.mrf.mxu1 }
 0x22a   : > { %v692_v27 = vmax.f32 %v690_v36, %v1830_v37 }
 0x22b   : > { %v1834_v2 = vpop.f32.mrf.mxu1 }
 0x22d   : > { %v1838_v14 = vpop.f32.mrf.mxu1 }
 0x22e   : > { %v693_v29 = vmax.f32 %v691_v38, %v1838_v14 }
 0x22f   : > { %v1842_v55 = vpop.f32.mrf.mxu1 }
 0x231   : > { %v1846_v59 = vpop.f32.mrf.mxu1 }
 0x232   : > { %2318 = vst [vmem:[#allocation23_spill] sm:$0xff] %v1846_v59  ;;  %v694_v33 = vmax.f32 %v692_v27, %v1846_v59  ;;  %v720_v27 = vmax.f32 %v718_v44, %v1786_v11 }
 0x233   : > { %v1850_v63 = vpop.f32.mrf.mxu1 }
 0x234   : > { %v722_v30 = vmax.f32 %v720_v27, %v1794_v16 }
 0x235   : > { %v1856_v6 = vpop.f32.mrf.mxu1 }
 0x236   : > { %2319 = vst [vmem:[#allocation24_spill] sm:$0xff] %v1856_v6  ;;  %v695_v35 = vmax.f32 %v693_v29, %v1856_v6  ;;  %v719_v6 = vmax.f32 %v717_v26, %v1782_v9 }
 0x237   : > { %v1863_v15 = vpop.f32.mrf.mxu1 }
 0x238   : > { %v721_v32 = vmax.f32 %v719_v6, %v1790_v13 }
 0x239   : > { %v1869_v42 = vpop.f32.mrf.mxu1 }
 0x23a   : > { %v696_v36 = vmax.f32 %v694_v33, %v1869_v42  ;;  %v724_v33 = vmax.f32 %v722_v30, %v1802_v20  ;;  %v723_v12 = vmax.f32 %v721_v32, %v1798_v18 }
 0x23b   : > { %v1875_v50 = vpop.f32.mrf.mxu1 }
 0x23c   : > { %v726_v46 = vmax.f32 %v724_v33, %v1810_v24  ;;  %v725_v58 = vmax.f32 %v723_v12, %v1806_v22 }
 0x23d   : > { %v1881_v54 = vpop.f32.mrf.mxu1 }
 0x23e   : > { %v697_v38 = vmax.f32 %v695_v35, %v1881_v54  ;;  %v727_v26 = vmax.f32 %v725_v58, %v1818_v28 }
 0x240   : > { %v698_v56 = vmax.f32 %v696_v36, %v697_v38  ;;  %v728_v38 = vmax.f32 %v726_v46, %v1826_v34  ;;  %v729_v6 = vmax.f32 %v727_v26, %v1834_v2 }
 0x242   : > { %v699_v29 = vrot.slane %v698_v56, 4  ;;  %v730_v27 = vmax.f32 %v728_v38, %v1842_v55  ;;  %v731_v32 = vmax.f32 %v729_v6, %v1850_v63 }
 0x244   : > { %v700_v59 = vmax.f32 %v698_v56, %v699_v29  ;;  %v1901_v56 = vpop.f32.mrf.mxu1  ;;  %v732_v29 = vmax.f32 %v730_v27, %v1863_v15  ;;  %v733_v33 = vmax.f32 %v731_v32, %v1875_v50 }
 0x246   : > { %v701_v35 = vrot.slane %v700_v59, 2 }
 0x248   : > { %v702_v36 = vmax.f32 %v700_v59, %v701_v35  ;;  %v734_v59 = vmax.f32 %v732_v29, %v1901_v56 }
 0x24a   : > { %v703_v44 = vrot.slane %v702_v36, 1  ;;  %v735_v58 = vmax.f32 %v733_v33, %v734_v59 }
 0x24c   : > { %v1905_v30 = vmax.f32 %v702_v36, %v703_v44  ;;  %v736_v6 = vrot.slane %v735_v58, 4 }
 0x24e   : > { %v742_v35 = vsub.f32 %v1716_v39, %v1905_v30  ;;  %v744_v12 = vsub.f32 %v1720_v41, %v1905_v30  ;;  %v746_v46 = vsub.f32 %v1724_v43, %v1905_v30  ;;  %v748_v36 = vsub.f32 %v1728_v45, %v1905_v30 }
 0x24f   : > { %v750_v26 = vsub.f32 %v1732_v47, %v1905_v30  ;;  %v752_v39 = vsub.f32 %v1736_v49, %v1905_v30  ;;  %v754_v43 = vsub.f32 %v1740_v51, %v1905_v30  ;;  %v737_v32 = vmax.f32 %v735_v58, %v736_v6  ;;  %v2320_v47 = vld [vmem:[#allocation15_spill] sm:$0xff]  ;;  %v2321_v51 = vld [vmem:[#allocation18_spill] sm:$0xff] }
 0x250   : > { %v806_v38 = vmul.f32 1.442695, %v742_v35  ;;  %v810_v44 = vmul.f32 1.442695, %v744_v12  ;;  %v814_v27 = vmul.f32 1.442695, %v746_v46  ;;  %v756_v45 = vsub.f32 %v1744_v53, %v1905_v30 }
 0x251   : > { %v818_v41 = vmul.f32 1.442695, %v748_v36  ;;  %v822_v29 = vmul.f32 1.442695, %v750_v26  ;;  %v826_v59 = vmul.f32 1.442695, %v752_v39  ;;  %v758_v33 = vsub.f32 %v2320_v47, %v1905_v30 }
 0x252   : > { %1280 = vpow2.f32 %v806_v38  ;;  %v830_v35 = vmul.f32 1.442695, %v754_v43  ;;  %v738_v12 = vrot.slane %v737_v32, 2  ;;  %v760_v49 = vsub.f32 %v1752_v57, %v1905_v30  ;;  %v2322_v6 = vld [vmem:[#allocation19_spill] sm:$0xff] }
 0x253   : > { %1282 = vpow2.f32 %v810_v44  ;;  %v834_v46 = vmul.f32 1.442695, %v756_v45  ;;  %v762_v36 = vsub.f32 %v2321_v51, %v1905_v30  ;;  %v838_v58 = vmul.f32 1.442695, %v758_v33  ;;  %v2323_v45 = vld [vmem:[#allocation20_spill] sm:$0xff] }
 0x254   : > { %1284 = vpow2.f32 %v814_v27  ;;  %v739_v38 = vmax.f32 %v737_v32, %v738_v12  ;;  %v764_v44 = vsub.f32 %v1760_v61, %v1905_v30  ;;  %v842_v26 = vmul.f32 1.442695, %v760_v49 }
 0x255   : > { %1286 = vpow2.f32 %v818_v41  ;;  %v766_v57 = vsub.f32 %v2322_v6, %v1905_v30  ;;  %v768_v39 = vsub.f32 %v1768_v1, %v1905_v30  ;;  %v846_v41 = vmul.f32 1.442695, %v762_v36  ;;  %v2324_v36 = vld [vmem:[#allocation21_spill] sm:$0xff]  ;;  %v2325_v6 = vld [vmem:[#allocation22_spill] sm:$0xff] }
 0x256   : > { %1288 = vpow2.f32 %v822_v29  ;;  %v770_v61 = vsub.f32 %v1772_v4, %v1905_v30  ;;  %v740_v32 = vrot.slane %v739_v38, 1  ;;  %v850_v47 = vmul.f32 1.442695, %v764_v44 }
 0x257   : > { %1290 = vpow2.f32 %v826_v59  ;;  %v772_v59 = vsub.f32 %v2323_v45, %v1905_v30  ;;  %v774_v1 = vsub.f32 %v1780_v8, %v1905_v30  ;;  %v854_v12 = vmul.f32 1.442695, %v766_v57 }
 0x258   : > { %1292 = vpow2.f32 %v830_v35  ;;  %v776_v49 = vsub.f32 %v1784_v10, %v1905_v30  ;;  %v862_v44 = vmul.f32 1.442695, %v770_v61  ;;  %v784_v45 = vsub.f32 %v1800_v19, %v1905_v30 }
 0x259   : > { %1294 = vpow2.f32 %v834_v46  ;;  %v858_v46 = vmul.f32 1.442695, %v768_v39  ;;  %v866_v8 = vmul.f32 1.442695, %v772_v59  ;;  %v782_v39 = vsub.f32 %v1796_v17, %v1905_v30 }
 0x25a   : > { %1296 = vpow2.f32 %v838_v58  ;;  %v778_v58 = vsub.f32 %v2324_v36, %v1905_v30  ;;  %v786_v19 = vsub.f32 %v1804_v21, %v1905_v30  ;;  %v2328_v21 = vld [vmem:[#allocation12_spill] sm:$0xff] }
 0x25b   : > { %1298 = vpow2.f32 %v842_v26  ;;  %v1962_v26 = vmax.f32 %v739_v38, %v740_v32  ;;  %v874_v38 = vmul.f32 1.442695, %v776_v49  ;;  %v886_v49 = vmul.f32 1.442695, %v782_v39 }
 0x25c   : > { %1300 = vpow2.f32 %v846_v41  ;;  %v870_v41 = vmul.f32 1.442695, %v774_v1  ;;  %v878_v59 = vmul.f32 1.442695, %v778_v58  ;;  %v2326_v1 = vld [vmem:[#allocation10_spill] sm:$0xff] }
 0x25d   : > { %1302 = vpow2.f32 %v850_v47  ;;  %v743_v47 = vsub.f32 %v1718_v40, %v1962_v26  ;;  %v2327_v40 = vld [vmem:[#allocation11_spill] sm:$0xff] }
 0x25e   : > { %1304 = vpow2.f32 %v854_v12  ;;  %v745_v12 = vsub.f32 %v2326_v1, %v1962_v26  ;;  %v747_v58 = vsub.f32 %v2327_v40, %v1962_v26  ;;  %v755_v40 = vsub.f32 %v1742_v52, %v1962_v26 }
 0x25f   : > { %v1932_v53 = vpop.eup %1280  ;;  %1306 = vpow2.f32 %v858_v46  ;;  %v890_v46 = vmul.f32 1.442695, %v784_v45  ;;  %v790_v45 = vsub.f32 %v1812_v25, %v1905_v30  ;;  %v2329_v25 = vld [vmem:[#allocation13_spill] sm:$0xff] }
 0x260   : > { %v1936_v27 = vpop.eup %1282  ;;  %1308 = vpow2.f32 %v862_v44  ;;  %v812_v39 = vmul.f32 1.442695, %v745_v12  ;;  %v753_v12 = vsub.f32 %v2329_v25, %v1962_v26 }
 0x261   : > { %v934_v43 = vadd.f32 %v1936_v27, %v1932_v53  ;;  %v1944_v29 = vpop.eup %1284  ;;  %1310 = vpow2.f32 %v866_v8 }
 0x262   : > { %v1951_v35 = vpop.eup %1286  ;;  %1312 = vpow2.f32 %v870_v41 }
 0x263   : > { %v935_v33 = vadd.f32 %v1944_v29, %v934_v43  ;;  %v1958_v51 = vpop.eup %1288  ;;  %v780_v43 = vsub.f32 %v2325_v6, %v1905_v30  ;;  %1314 = vpow2.f32 %v874_v38  ;;  %v788_v6 = vsub.f32 %v1808_v23, %v1905_v30 }
 0x264   : > { %v1967_v10 = vpop.eup %1290  ;;  %1316 = vpow2.f32 %v878_v59  ;;  %v894_v38 = vmul.f32 1.442695, %v786_v19  ;;  %v751_v23 = vsub.f32 %v1734_v48, %v1962_v26  ;;  %v816_v59 = vmul.f32 1.442695, %v747_v58 }
 0x265   : > { %v936_v4 = vadd.f32 %v1951_v35, %v935_v33  ;;  %v1974_v32 = vpop.eup %1292  ;;  %v882_v33 = vmul.f32 1.442695, %v780_v43  ;;  %v808_v43 = vmul.f32 1.442695, %v743_v47  ;;  %v794_v48 = vsub.f32 %v1830_v37, %v1905_v30 }
 0x266   : > { %v824_v58 = vmul.f32 1.442695, %v751_v23 }
 0x267   : > { %v937_v57 = vadd.f32 %v1958_v51, %v936_v4  ;;  %v1981_v4 = vpop.eup %1294  ;;  %1318 = vpow2.f32 %v882_v33  ;;  %v792_v33 = vsub.f32 %v1822_v31, %v1905_v30  ;;  %v910_v52 = vmul.f32 1.442695, %v794_v48 }
 0x268   : > { %v1988_v44 = vpop.eup %1296  ;;  %1320 = vpow2.f32 %v886_v49 }
 0x269   : > { %v938_v61 = vadd.f32 %v1967_v10, %v937_v57  ;;  %v749_v57 = vsub.f32 %v2328_v21, %v1962_v26  ;;  %v1995_v41 = vpop.eup %1298  ;;  %1322 = vpow2.f32 %v890_v46  ;;  %v902_v46 = vmul.f32 1.442695, %v790_v45 }
 0x26a   : > { %v2002_v47 = vpop.eup %1300  ;;  %1324 = vpow2.f32 %v808_v43  ;;  %v796_v43 = vsub.f32 %v1838_v14, %v1905_v30  ;;  %v828_v45 = vmul.f32 1.442695, %v753_v12  ;;  %v2334_v12 = vld [vmem:[#allocation17_spill] sm:$0xff] }
 0x26b   : > { %v939_v17 = vadd.f32 %v1974_v32, %v938_v61  ;;  %1326 = vpow2.f32 %v812_v39  ;;  %v820_v19 = vmul.f32 1.442695, %v749_v57  ;;  %v2009_v49 = vpop.eup %1302  ;;  %v2330_v57 = vld [vmem:[#allocation14_spill] sm:$0xff] }
 0x26c   : > { %1328 = vpow2.f32 %v894_v38  ;;  %v757_v39 = vsub.f32 %v2330_v57, %v1962_v26  ;;  %v914_v25 = vmul.f32 1.442695, %v796_v43 }
 0x26d   : > { %v940_v36 = vadd.f32 %v1981_v4, %v939_v17  ;;  %v898_v17 = vmul.f32 1.442695, %v788_v6  ;;  %1330 = vpow2.f32 %v816_v59 }
 0x26f   : > { %v941_v8 = vadd.f32 %v1988_v44, %v940_v36  ;;  %v2013_v36 = vpop.eup %1304  ;;  %1332 = vpow2.f32 %v898_v17  ;;  %v832_v17 = vmul.f32 1.442695, %v755_v40 }
 0x270   : > { %v2018_v6 = vpop.eup %1306  ;;  %1334 = vpow2.f32 %v820_v19  ;;  %v761_v19 = vsub.f32 %v2334_v12, %v1962_v26 }
 0x271   : > { %v942_v61 = vadd.f32 %v1995_v41, %v941_v8  ;;  %v906_v8 = vmul.f32 1.442695, %v792_v33  ;;  %v2022_v21 = vpop.eup %1308  ;;  %1336 = vpow2.f32 %v902_v46  ;;  %v773_v33 = vsub.f32 %v1778_v7, %v1962_v26 }
 0x272   : > { %v2027_v38 = vpop.eup %1310  ;;  %1338 = vpow2.f32 %v824_v58  ;;  %v763_v7 = vsub.f32 %v1758_v60, %v1962_v26 }
 0x273   : > { %v943_v1 = vadd.f32 %v2002_v47, %v942_v61  ;;  %v2331_v61 = vld [vmem:[#allocation16_spill] sm:$0xff]  ;;  %v2031_v59 = vpop.eup %1312  ;;  %1340 = vpow2.f32 %v906_v8  ;;  %v769_v8 = vsub.f32 %v1770_v3, %v1962_v26  ;;  %v2338_v3 = vld [vmem:[#allocation23_spill] sm:$0xff] }
 0x274   : > { %v759_v23 = vsub.f32 %v2331_v61, %v1962_v26  ;;  %2332 = vst [vmem:[#allocation15_spill] sm:$0xff] %v2031_v59  ;;  %1342 = vpow2.f32 %v828_v45  ;;  %v868_v61 = vmul.f32 1.442695, %v773_v33  ;;  %v798_v33 = vsub.f32 %v2338_v3, %v1905_v30 }
 0x275   : > { %v944_v31 = vadd.f32 %v2009_v49, %v943_v1  ;;  %v2036_v1 = vpop.eup %1314  ;;  %1344 = vpow2.f32 %v910_v52  ;;  %v767_v52 = vsub.f32 %v1766_v0, %v1962_v26  ;;  %v2339_v0 = vld [vmem:[#allocation24_spill] sm:$0xff] }
 0x276   : > { %2333 = vst [vmem:[#allocation18_spill] sm:$0xff] %v2036_v1  ;;  %v2040_v48 = vpop.eup %1316  ;;  %v840_v40 = vmul.f32 1.442695, %v759_v23  ;;  %1346 = vpow2.f32 %v832_v17  ;;  %v848_v17 = vmul.f32 1.442695, %v763_v7 }
 0x277   : > { %v945_v37 = vadd.f32 %v2013_v36, %v944_v31  ;;  %2335 = vst [vmem:[#allocation19_spill] sm:$0xff] %v2040_v48  ;;  %v771_v31 = vsub.f32 %v1774_v5, %v1962_v26  ;;  %v2045_v57 = vpop.eup %1318  ;;  %1348 = vpow2.f32 %v914_v25  ;;  %v765_v5 = vsub.f32 %v1762_v62, %v1962_v26 }
 0x278   : > { %2336 = vst [vmem:[#allocation20_spill] sm:$0xff] %v2045_v57  ;;  %v2049_v58 = vpop.eup %1320 }
 0x279   : > { %v946_v14 = vadd.f32 %v2018_v6, %v945_v37  ;;  %v836_v37 = vmul.f32 1.442695, %v757_v39  ;;  %2337 = vst [vmem:[#allocation21_spill] sm:$0xff] %v2049_v58  ;;  %v844_v39 = vmul.f32 1.442695, %v761_v19 }
 0x27a   : > { %v864_v23 = vmul.f32 1.442695, %v771_v31  ;;  %v860_v19 = vmul.f32 1.442695, %v769_v8  ;;  %v800_v31 = vsub.f32 %v2339_v0, %v1905_v30 }
 0x27b   : > { %v947_v46 = vadd.f32 %v2022_v21, %v946_v14  ;;  %v2054_v14 = vpop.eup %1322  ;;  %1350 = vpow2.f32 %v836_v37  ;;  %v852_v37 = vmul.f32 1.442695, %v765_v5 }
 0x27c   : > { %v2058_v45 = vpop.eup %1324  ;;  %1352 = vpow2.f32 %v840_v40  ;;  %v856_v40 = vmul.f32 1.442695, %v767_v52  ;;  %v804_v52 = vsub.f32 %v1881_v54, %v1905_v30  ;;  %v775_v54 = vsub.f32 %v1782_v9, %v1962_v26 }
 0x27d   : > { %v948_v43 = vadd.f32 %v2027_v38, %v947_v46  ;;  %v2063_v12 = vpop.eup %1326  ;;  %1354 = vpow2.f32 %v868_v61  ;;  %v802_v61 = vsub.f32 %v1869_v42, %v1905_v30  ;;  %v779_v9 = vsub.f32 %v1790_v13, %v1962_v26 }
 0x27e   : > { %v2067_v25 = vpop.eup %1328  ;;  %v971_v46 = vadd.f32 %v2063_v12, %v2058_v45  ;;  %1356 = vpow2.f32 %v844_v39 }
 0x27f   : > { %v949_v60 = vadd.f32 %v2031_v59, %v948_v43  ;;  %v2072_v43 = vpop.eup %1330  ;;  %1358 = vpow2.f32 %v864_v23 }
 0x280   : > { %v2076_v59 = vpop.eup %1332  ;;  %1360 = vpow2.f32 %v848_v17 }
 0x281   : > { %v950_v62 = vadd.f32 %v2036_v1, %v949_v60  ;;  %v972_v60 = vadd.f32 %v2072_v43, %v971_v46  ;;  %v2080_v8 = vpop.eup %1334  ;;  %v918_v1 = vmul.f32 1.442695, %v798_v33  ;;  %1362 = vpow2.f32 %v860_v19 }
 0x282   : > { %v2084_v3 = vpop.eup %1336  ;;  %1364 = vpow2.f32 %v852_v37  ;;  %v926_v46 = vmul.f32 1.442695, %v802_v61  ;;  %v777_v61 = vsub.f32 %v1786_v11, %v1962_v26  ;;  %v781_v11 = vsub.f32 %v1794_v16, %v1962_v26 }
 0x283   : > { %v951_v7 = vadd.f32 %v2040_v48, %v950_v62  ;;  %v973_v5 = vadd.f32 %v2080_v8, %v972_v60  ;;  %v2088_v0 = vpop.eup %1338  ;;  %v922_v62 = vmul.f32 1.442695, %v800_v31  ;;  %1366 = vpow2.f32 %v856_v40 }
 0x284   : > { %v2092_v23 = vpop.eup %1340  ;;  %1368 = vpow2.f32 %v918_v1  ;;  %v930_v31 = vmul.f32 1.442695, %v804_v52  ;;  %v876_v48 = vmul.f32 1.442695, %v777_v61  ;;  %v880_v16 = vmul.f32 1.442695, %v779_v9 }
 0x285   : > { %v952_v39 = vadd.f32 %v2045_v57, %v951_v7  ;;  %v974_v17 = vadd.f32 %v2088_v0, %v973_v5  ;;  %v2096_v33 = vpop.eup %1342  ;;  %1370 = vpow2.f32 %v922_v62  ;;  %v785_v61 = vsub.f32 %v1802_v20, %v1962_v26 }
 0x286   : > { %v2098_v19 = vpop.eup %1344  ;;  %1372 = vpow2.f32 %v926_v46 }
 0x287   : > { %v953_v42 = vadd.f32 %v2049_v58, %v952_v39  ;;  %v975_v30 = vadd.f32 %v2096_v33, %v974_v17  ;;  %v2104_v37 = vpop.eup %1346  ;;  %1374 = vpow2.f32 %v930_v31 }
 0x288   : > { %v2106_v60 = vpop.eup %1348 }
 0x289   : > { %v954_v7 = vadd.f32 %v2054_v14, %v953_v42  ;;  %v976_v1 = vadd.f32 %v2104_v37, %v975_v30  ;;  %v2112_v39 = vpop.eup %1350  ;;  %v872_v42 = vmul.f32 1.442695, %v775_v54  ;;  %v783_v54 = vsub.f32 %v1798_v18, %v1962_v26 }
 0x28a   : > { %v2116_v5 = vpop.eup %1352  ;;  %v884_v18 = vmul.f32 1.442695, %v781_v11  ;;  %v892_v11 = vmul.f32 1.442695, %v785_v61  ;;  %v803_v61 = vsub.f32 %v1875_v50, %v1962_v26 }
 0x28b   : > { %v955_v40 = vadd.f32 %v2067_v25, %v954_v7  ;;  %v977_v62 = vadd.f32 %v2112_v39, %v976_v1  ;;  %v2120_v17 = vpop.eup %1354  ;;  %1376 = vpow2.f32 %v872_v42  ;;  %v787_v42 = vsub.f32 %v1806_v22, %v1962_v26 }
 0x28c   : > { %v1357_v7 = vpop.eup %1356  ;;  %1012 = vmatprep.subr.mxu0 %v2120_v17  ;;  %1378 = vpow2.f32 %v876_v48  ;;  %v789_v48 = vsub.f32 %v1810_v24, %v1962_v26 }
 0x28d   : > { %v956_v52 = vadd.f32 %v2076_v59, %v955_v40  ;;  %v978_v13 = vadd.f32 %v2116_v5, %v977_v62  ;;  %v1359_v46 = vpop.eup %1358  ;;  %1013 = vmatpush1.msra.mxu0 %v2027_v38  ;;  %1380 = vpow2.f32 %v880_v16  ;;  %v793_v16 = vsub.f32 %v1826_v34, %v1962_v26 }
 0x28e   : > { %v1361_v40 = vpop.eup %1360  ;;  %1014 = vmatprep.subr.mxu0 %v1359_v46  ;;  %1382 = vpow2.f32 %v884_v18 }
 0x28f   : > { %v957_v30 = vadd.f32 %v2084_v3, %v956_v52  ;;  %v979_v57 = vadd.f32 %v1357_v7, %v978_v13  ;;  %v1363_v31 = vpop.eup %1362  ;;  %1015 = vmatpush1.msra.mxu0 %v2022_v21  ;;  %v791_v13 = vsub.f32 %v1818_v28, %v1962_v26 }
 0x290   : > { %v1365_v52 = vpop.eup %1364  ;;  %1016 = vmatprep.subr.mxu0 %v1363_v31 }
 0x291   : > { %v958_v1 = vadd.f32 %v2092_v23, %v957_v30  ;;  %v980_v58 = vadd.f32 %v1361_v40, %v979_v57  ;;  %v1367_v38 = vpop.eup %1366  ;;  %1017 = vmatpush1.msra.mxu0 %v2018_v6  ;;  %v888_v30 = vmul.f32 1.442695, %v783_v54  ;;  %v904_v34 = vmul.f32 1.442695, %v791_v13 }
 0x292   : > { %1018 = vmatprep.subr.mxu0 %v1367_v38  ;;  %v2139_v21 = vpop.eup %1368 }
 0x293   : > { %v959_v62 = vadd.f32 %v2098_v19, %v958_v1  ;;  %v981_v20 = vadd.f32 %v1365_v52, %v980_v58  ;;  %1019 = vmatpush1.msra.mxu0 %v2013_v36  ;;  %v2145_v6 = vpop.eup %1370  ;;  %v805_v58 = vsub.f32 %v1901_v56, %v1962_v26  ;;  %1384 = vpow2.f32 %v888_v30 }
 0x294   : > { %1020 = vmatprep.subr.mxu0 %v1365_v52  ;;  %v896_v36 = vmul.f32 1.442695, %v787_v42  ;;  %v2153_v1 = vpop.eup %1372  ;;  %1386 = vpow2.f32 %v892_v11  ;;  %v900_v56 = vmul.f32 1.442695, %v789_v48 }
 0x295   : > { %v960_v9 = vadd.f32 %v2106_v60, %v959_v62  ;;  %v982_v22 = vadd.f32 %v1367_v38, %v981_v20  ;;  %1021 = vmatpush1.msra.mxu0 %v2009_v49  ;;  %v2161_v52 = vpop.eup %1374 }
 0x296   : > { %1022 = vmatprep.subr.mxu0 %v1361_v40  ;;  %v795_v40 = vsub.f32 %v1834_v2, %v1962_v26  ;;  %1388 = vpow2.f32 %v896_v36  ;;  %v797_v2 = vsub.f32 %v1842_v55, %v1962_v26 }
 0x297   : > { %v961_v57 = vadd.f32 %v2139_v21, %v960_v9  ;;  %v983_v54 = vadd.f32 %v1363_v31, %v982_v22  ;;  %1023 = vmatpush1.msra.mxu0 %v2002_v47  ;;  %v801_v31 = vsub.f32 %v1863_v15, %v1962_v26  ;;  %v932_v47 = vmul.f32 1.442695, %v805_v58 }
 0x298   : > { %1024 = vmatprep.subr.mxu0 %v1357_v7  ;;  %v2173_v7 = vpop.eup %1376  ;;  %v799_v15 = vsub.f32 %v1850_v63, %v1962_v26  ;;  %1390 = vpow2.f32 %v900_v56  ;;  %v916_v63 = vmul.f32 1.442695, %v797_v2  ;;  %v1412_v2 = vld [vmem:[%s1629_s29] sm:$0xff] }
 0x299   : > { %v962_v24 = vadd.f32 %v2145_v6, %v961_v57  ;;  %v984_v49 = vadd.f32 %v1359_v46, %v983_v54  ;;  %1025 = vmatpush1.msra.mxu0 %v1995_v41  ;;  %v908_v46 = vmul.f32 1.442695, %v793_v16  ;;  %v928_v41 = vmul.f32 1.442695, %v803_v61 }
 0x29a   : > { %1026 = vmatprep.subr.mxu0 %v2116_v5  ;;  %1392 = vpow2.f32 %v904_v34  ;;  %v912_v5 = vmul.f32 1.442695, %v795_v40  ;;  %v924_v38 = vmul.f32 1.442695, %v801_v31  ;;  %v920_v26 = vmul.f32 1.442695, %v799_v15 }
 0x29b   : > { %v963_v28 = vadd.f32 %v2153_v1, %v962_v24  ;;  %v985_v62 = vadd.f32 %v2120_v17, %v984_v49  ;;  %1027 = vmatpush1.msra.mxu0 %v1988_v44  ;;  %v2182_v17 = vpop.eup %1378  ;;  %1394 = vpow2.f32 %v932_v47  ;;  %v2346_v15 = vld [vmem:[#allocation8_spill] sm:$0xff] }
 0x29c   : > { %1028 = vmatprep.subr.mxu0 %v2112_v39  ;;  %v2187_v44 = vpop.eup %1380  ;;  %1396 = vpow2.f32 %v908_v46 }
 0x29d   : > { %v2169_v50 = vadd.f32 %v2161_v52, %v963_v28  ;;  %v986_v18 = vadd.f32 %v2173_v7, %v985_v62  ;;  %1029 = vmatpush1.msra.mxu0 %v1981_v4  ;;  %1398 = vpow2.f32 %v928_v41  ;;  %v2192_v42 = vpop.eup %1382 }
 0x29e   : > { %1030 = vmatprep.subr.mxu0 %v2104_v37  ;;  %1400 = vpow2.f32 %v912_v5 }
 0x29f   : > { %v987_v55 = vadd.f32 %v2182_v17, %v986_v18  ;;  %1031 = vmatpush1.msra.mxu0 %v1974_v32  ;;  %1402 = vpow2.f32 %v924_v38 }
 0x2a0   : > { %1032 = vmatprep.subr.mxu0 %v2096_v33  ;;  %v1385_v37 = vpop.eup %1384  ;;  %1404 = vpow2.f32 %v916_v63 }
 0x2a1   : > { %v988_v39 = vadd.f32 %v2187_v44, %v987_v55  ;;  %1033 = vmatpush1.msra.mxu0 %v1967_v10  ;;  %1406 = vpow2.f32 %v920_v26  ;;  %v1387_v9 = vpop.eup %1386 }
 0x2a2   : > { %1034 = vmatprep.subr.mxu0 %v2088_v0 }
 0x2a3   : > { %v989_v4 = vadd.f32 %v2192_v42, %v988_v39  ;;  %1035 = vmatpush1.msra.mxu0 %v1958_v51  ;;  %v1389_v10 = vpop.eup %1388 }
 0x2a4   : > { %1036 = vmatprep.subr.mxu0 %v2080_v8 }
 0x2a5   : > { %v990_v32 = vadd.f32 %v1385_v37, %v989_v4  ;;  %1037 = vmatpush1.msra.mxu0 %v1951_v35  ;;  %v1391_v0 = vpop.eup %1390 }
 0x2a6   : > { %1038 = vmatprep.subr.mxu0 %v2072_v43 }
 0x2a7   : > { %v991_v33 = vadd.f32 %v1387_v9, %v990_v32  ;;  %1039 = vmatpush1.msra.mxu0 %v1944_v29  ;;  %v1393_v51 = vpop.eup %1392 }
 0x2a8   : > { %1040 = vmatprep.subr.mxu0 %v2063_v12  ;;  %v1395_v8 = vpop.eup %1394 }
 0x2a9   : > { %v992_v30 = vadd.f32 %v1389_v10, %v991_v33  ;;  %1041 = vmatpush1.msra.mxu0 %v1936_v27  ;;  %v1397_v35 = vpop.eup %1396 }
 0x2aa   : > { %1042 = vmatprep.subr.mxu0 %v2058_v45  ;;  %v1399_v43 = vpop.eup %1398 }
 0x2ab   : > { %v993_v20 = vadd.f32 %v1391_v0, %v992_v30  ;;  %1043 = vmatpush1.msra.mxu0 %v1932_v53  ;;  %v1401_v29 = vpop.eup %1400 }
 0x2ac   : > { %1044 = vmatprep.subr.mxu0 %v1395_v8  ;;  %v1403_v12 = vpop.eup %1402 }
 0x2ad   : > { %v994_v48 = vadd.f32 %v1393_v51, %v993_v20  ;;  %1045 = vmatpush2.msra.mxu0 %v2161_v52  ;;  %v1405_v27 = vpop.eup %1404 }
 0x2ae   : > { %1046 = vmatprep.subr.mxu0 %v1399_v43  ;;  %v1407_v22 = vpop.eup %1406 }
 0x2af   : > { %v995_v57 = vadd.f32 %v1397_v35, %v994_v48  ;;  %1047 = vmatpush2.msra.mxu0 %v2153_v1 }
 0x2b0   : > { %1048 = vmatprep.subr.mxu0 %v1403_v12 }
 0x2b1   : > { %v996_v11 = vadd.f32 %v1401_v29, %v995_v57  ;;  %1049 = vmatpush2.msra.mxu0 %v2145_v6 }
 0x2b2   : > { %1050 = vmatprep.subr.mxu0 %v1407_v22 }
 0x2b3   : > { %v997_v45 = vadd.f32 %v1405_v27, %v996_v11  ;;  %1051 = vmatpush2.msra.mxu0 %v2139_v21  ;;  %v965_v21 = vrot.slane %v2169_v50, 4 }
 0x2b4   : > { %1052 = vmatprep.subr.mxu0 %v1405_v27 }
 0x2b5   : > { %v998_v53 = vadd.f32 %v1407_v22, %v997_v45  ;;  %1053 = vmatpush2.msra.mxu0 %v2106_v60  ;;  %v2340_v60 = vld [vmem:[#allocation21_spill] sm:$0xff]  ;;  %v966_v36 = vadd.f32 %v965_v21, %v2169_v50 }
 0x2b6   : > { %1054 = vmatprep.subr.mxu0 %v1401_v29 }
 0x2b7   : > { %v999_v13 = vadd.f32 %v1403_v12, %v998_v53  ;;  %1055 = vmatpush2.msra.mxu0 %v2098_v19  ;;  %v2341_v19 = vld [vmem:[#allocation20_spill] sm:$0xff]  ;;  %v967_v1 = vrot.slane %v966_v36, 2 }
 0x2b8   : > { %1056 = vmatprep.subr.mxu0 %v1397_v35 }
 0x2b9   : > { %v1000_v58 = vadd.f32 %v1399_v43, %v999_v13  ;;  %1057 = vmatpush2.msra.mxu0 %v2092_v23  ;;  %v2342_v23 = vld [vmem:[#allocation19_spill] sm:$0xff]  ;;  %v968_v61 = vadd.f32 %v967_v1, %v966_v36 }
 0x2ba   : > { %1058 = vmatprep.subr.mxu0 %v1393_v51 }
 0x2bb   : > { %v1001_v24 = vadd.f32 %v1395_v8, %v1000_v58  ;;  %1059 = vmatpush2.msra.mxu0 %v2084_v3  ;;  %v2344_v3 = vld [vmem:[#allocation9_spill] sm:$0xff]  ;;  %v969_v56 = vrot.slane %v968_v61, 1 }
 0x2bc   : > { %1060 = vmatprep.subr.mxu0 %v1391_v0 }
 0x2bd   : > { %1061 = vmatpush2.msra.mxu0 %v2076_v59  ;;  %v2343_v59 = vld [vmem:[#allocation18_spill] sm:$0xff]  ;;  %v1002_v6 = vrot.slane %v1001_v24, 4  ;;  %v970_v52 = vadd.f32 %v969_v56, %v968_v61 }
 0x2be   : > { %1062 = vmatprep.subr.mxu0 %v1389_v10 }
 0x2bf   : > { %1063 = vmatpush2.msra.mxu0 %v2067_v25  ;;  %v1008_v25 = vrot.slane %v2344_v3, 4  ;;  %v1003_v54 = vadd.f32 %v1002_v6, %v1001_v24  ;;  %1408 = vrcp.f32 %v970_v52 }
 0x2c0   : > { %1064 = vmatprep.subr.mxu0 %v1387_v9 }
 0x2c1   : > { %1065 = vmatpush2.msra.mxu0 %v2054_v14  ;;  %v2345_v14 = vld [vmem:[#allocation15_spill] sm:$0xff]  ;;  %v1004_v16 = vrot.slane %v1003_v54, 2 }
 0x2c2   : > { %1066 = vmatprep.subr.mxu0 %v1385_v37 }
 0x2c3   : > { %1067 = vmatpush2.msra.mxu0 %v2340_v60  ;;  %v1005_v28 = vadd.f32 %v1004_v16, %v1003_v54 }
 0x2c4   : > { %1068 = vmatprep.subr.mxu0 %v2192_v42 }
 0x2c5   : > { %1069 = vmatpush2.msra.mxu0 %v2341_v19  ;;  %v1006_v49 = vrot.slane %v1005_v28, 1 }
 0x2c6   : > { %1070 = vmatprep.subr.mxu0 %v2187_v44 }
 0x2c7   : > { %1071 = vmatpush2.msra.mxu0 %v2342_v23  ;;  %v1007_v40 = vadd.f32 %v1006_v49, %v1005_v28 }
 0x2c8   : > { %1072 = vmatprep.subr.mxu0 %v2182_v17 }
 0x2c9   : > { %1073 = vmatpush2.msra.mxu0 %v2343_v59  ;;  %1410 = vrcp.f32 %v1007_v40 }
 0x2ca   : > { %1074 = vmatprep.subr.mxu0 %v2173_v7 }
 0x2cb   : > { %1075 = vmatpush2.msra.mxu0 %v2345_v14 }
 0x2cc   : > { %1077 = vmatmul.mubr.f32.vlgmr.msra.gmra.mxu0 %v1008_v25  ;;  %v1409_v31 = vpop.eup %1408 }
 0x2d6   : > { %v1411_v62 = vpop.eup %1410 }
 0x38c   : > { %v1078_v34 = vpop.f32.mrf.mxu0 }
 0x38d   : > { %v1085_v47 = vmul.f32 %v1409_v31, %v1078_v34 }
 0x38e   : > { %v1080_v50 = vpop.f32.mrf.mxu0 }
 0x38f   : > { %v1086_v7 = vmul.f32 %v1411_v62, %v1080_v50  ;;  %v1087_v46 = vadd.f32 %v1412_v2, %v1085_v47 }
 0x391   : > { %v1088_v41 = vadd.f32 %v1086_v7, %v2346_v15 }
 0x393   : > { %v1091_v18 = vcombine.low %v1087_v46, %v1088_v41 }
 0x395   : > { %1093 = vst [vmem:[%s159_s3] sm:$0xff] %v1091_v18 }
 0x396   : > { %1454 = shalt.err (!%p1451_p10)
}
 0x397   : > { %s1455_s19 = scalar_lea.hbm %s1107_s7, 128  ;;  %s1459_s25 = scalar_lea.hbm %s2270_s2, 256 }
 0x398   : > { %p1456_p2 = scmp.ne.s32.totalorder %s1107_s7, %s1455_s19  ;;  %p1460_p7 = scmp.lt.s32.totalorder %s1107_s7, %s2270_s2 }
 0x399   : > { %p1461_p0 = scmp.lt.s32.totalorder %s1459_s25, %s1455_s19 }
 0x39a   : > { %p1457_p4 = pnand %p1456_p2, %p2347_p12 }
 0x39b   : > { %p1462_p6 = por %p1461_p0, %p1460_p7 }
 0x39c   : > { %p1458_p9 = pneg %p1457_p4 }
 0x39e   : > { %p1463_p11 = pnand %p1462_p6, %p1458_p9 }
 0x3a0   : > { %1466 = shalt.err (!%p1463_p11)
}
 0x3a1   : > { %1234 = dma.vmem_to_hbm [thread:$0]  (%p2347_p12), %s1110_s4, 128, %s1107_s7, %s1095_s8  }
 0x3a2 PF: > { %s1121_s29 = sand.u32 1, %s1493_s9   ;;  %p2348_p13 = scmp.ne.s32.totalorder %s2298_s22, 0 }
 0x3a3   : > { %p2349_p1 = scmp.ge.s32.totalorder %s1505_s12, 2  ;;  %s1122_s28 = scalar_lea.sflag [#allocation4], %s1121_s29 }
 0x3a5   : > { %p1241_p3 = pnand %p2349_p1, %p2348_p13 }
 0x3a7   : > { %p1242_p5 = pneg %p1241_p3 }
 0x3a9   : > { %1488 = dma.done.wait (%p1242_p5), %s1122_s28, 128  }
 0x3aa   : > { %1490 = vsyncadd (%p1242_p5), %s1122_s28, 4294967168  ;;  %p15_p8 = scmp.ge.s32.totalorder %s1550_s15, 4   ;;  %s2350_s9 = smov %s1497_s10 }
 0x3ab   : > { %s2351_s10 = smov %s1501_s11  ;;  %s2352_s11 = smov %s1562_s18 }
 0x3ac   : > { %s2353_s12 = smov %s1550_s15  ;;  %17 = sbr.rel (!%p15_p8) target bundleno = 5 (0x5), region = 73 }
 0x3b1   :  { %1127 = vsyncpa [#allocation3], 1 }
 0x3b2   :  { %1129 = vsyncpa [#allocation3 + $0x1], 1 }
 0x3b3   :  { %1130 = vsyncpa [#allocation4], 1 }
 0x3b4   :  { %1132 = vsyncpa [#allocation4 + $0x1], 1 }

</bundles_post_ra>
